<compile_context>
chip_gen: v6e
topology: v6e:2x2x1
jax: 0.10.0
libtpu: 0.0.40
codegen_flags: <defaults>
</compile_context>

<pallas_src>
from functools import partial

import jax
import jax.numpy as jnp
from jax import lax
from jax.experimental import pallas as pl
from jax.experimental.pallas import tpu as pltpu

EPS = 1e-6
MXU_DTYPE = jnp.bfloat16   # conv matmul operand dtype (f32 accumulation)
NUM_GROUPS = 32            # GroupNorm(32) per the PyTorch module


# -----------------------------------------------------------------------------
# In-kernel helpers
# -----------------------------------------------------------------------------
def _swish(v):
    # Exact x*sigmoid(x) == 0.5*x*(1+tanh(x/2)): a single EUP push per element
    # (tanh) instead of exp + reciprocal, and no approx-reciprocal drift.
    return 0.5 * v * (1.0 + jnp.tanh(0.5 * v))


def _swish_host(v):  # wrapper / reference side (plain JAX)
    return v * jax.nn.sigmoid(v)


def _groupnorm_swish(x2d, gs, gb, gamma_row, beta_row):
    """GroupNorm(32, eps=1e-6) + swish over a (HW, C) f32 tile.

    Single-pass stats (sum and sum-of-squares); the per-group reduce+broadcast
    is two tiny matmuls against resident (C, G) / (G, C) factor matrices
    (DMA'd once, constant index_map), and the affine is folded into one
    scale/shift so the normalize apply is a single multiply-add pass.
    """
    s1 = jnp.sum(x2d, axis=0, keepdims=True)                      # (1, C)
    s2 = jnp.sum(x2d * x2d, axis=0, keepdims=True)                # (1, C)
    mean = jnp.dot(jnp.dot(s1, gs, preferred_element_type=jnp.float32), gb,
                   preferred_element_type=jnp.float32)            # (1, C)
    ex2 = jnp.dot(jnp.dot(s2, gs, preferred_element_type=jnp.float32), gb,
                  preferred_element_type=jnp.float32)             # (1, C)
    var = ex2 - mean * mean
    scale = lax.rsqrt(var + EPS) * gamma_row                      # (1, C)
    shift = beta_row - mean * scale                               # (1, C)
    return _swish(x2d * scale + shift)


def _build_im2col(im_ref, h2d, H, W, C):
    """Fill the flat ((H+2)*W, 3*C) bf16 halo/im2col scratch.

    Lane bands: [h shifted +1 col | h | h shifted -1 col]; the column shifts
    are flat-row XLU rolls + column-boundary masks (no unaligned sublane
    slices).  Interior rows are fully rewritten every step; only the two zero
    pad image-rows are (re)zeroed (cheap, and safe when the batch grid axis is
    split across TensorCores).
    """
    HW = H * W
    col = lax.broadcasted_iota(jnp.int32, (H, W, C), 1).reshape(HW, C)
    left = jnp.where(col == 0, 0.0, pltpu.roll(h2d, shift=1, axis=0))
    right = jnp.where(col == W - 1, 0.0, pltpu.roll(h2d, shift=HW - 1, axis=0))
    zrow = jnp.zeros((W, 3 * C), im_ref.dtype)
    im_ref[0:W, :] = zrow                                  # top pad image-row
    im_ref[(H + 1) * W:(H + 2) * W, :] = zrow              # bottom pad image-row
    im_ref[W:(H + 1) * W, 0:C] = left.astype(im_ref.dtype)
    im_ref[W:(H + 1) * W, C:2 * C] = h2d.astype(im_ref.dtype)
    im_ref[W:(H + 1) * W, 2 * C:3 * C] = right.astype(im_ref.dtype)


def _conv3x3_bands(im_ref, w_ref, H, W, Cout):
    """3x3 conv as 3 MXU matmuls with K = 3*C (one per dy row band).

    dy is realized as a flat-row offset (a multiple of W) into the padded
    scratch; bf16 operands, f32 accumulation.
    """
    HW = H * W
    acc = jnp.zeros((HW, Cout), jnp.float32)
    for dy in range(3):
        patch = im_ref[dy * W:dy * W + HW, :]               # (HW, 3*C) bf16
        acc = acc + jnp.dot(patch, w_ref[dy],
                            preferred_element_type=jnp.float32)
    return acc


# -----------------------------------------------------------------------------
# Kernel A: GroupNorm + swish + conv1 (3x3) + bias + temb projection add
# -----------------------------------------------------------------------------
def gn_conv1_temb_kernel(x_ref, gs_ref, gb_ref, g_ref, b_ref, w_ref, bias_ref,
                         tp_ref, o_ref, im_ref, *, H, W, Cin, Cout):
    HW = H * W
    x = x_ref[0].reshape(HW, Cin)
    h = _groupnorm_swish(x, gs_ref[...], gb_ref[...], g_ref[...], b_ref[...])
    _build_im2col(im_ref, h, H, W, Cin)
    acc = _conv3x3_bands(im_ref, w_ref, H, W, Cout)
    row = bias_ref[...] + tp_ref[0]          # conv1 bias + per-image temb row
    o_ref[0] = (acc + row).reshape(H, W, Cout).astype(o_ref.dtype)


# -----------------------------------------------------------------------------
# Kernel B: GroupNorm + swish + conv2 (3x3) + bias + shortcut + residual add
# -----------------------------------------------------------------------------
def make_gn_conv2_res_kernel(H, W, Cmid, Cin, Cout, use_nin):
    HW = H * W

    def kernel(*refs):
        if use_nin:
            (h_ref, gs_ref, gb_ref, g_ref, b_ref, w_ref, row_ref, x_ref,
             nw_ref, o_ref, im_ref) = refs
        else:
            (h_ref, gs_ref, gb_ref, g_ref, b_ref, w_ref, row_ref, x_ref,
             o_ref, im_ref) = refs

        hin = h_ref[0].reshape(HW, Cmid)
        hn = _groupnorm_swish(hin, gs_ref[...], gb_ref[...],
                              g_ref[...], b_ref[...])
        # TODO(synk): nn.Dropout is inference-mode identity here (no RNG mask).
        _build_im2col(im_ref, hn, H, W, Cmid)
        acc = _conv3x3_bands(im_ref, w_ref, H, W, Cout)

        xs = x_ref[0].reshape(HW, Cin)
        if use_nin:       # Cin != Cout: 1x1 NiN shortcut on the MXU
            sc = jnp.dot(xs.astype(MXU_DTYPE), nw_ref[...],
                         preferred_element_type=jnp.float32)
        else:             # Cin == Cout: identity shortcut
            sc = xs
        # row_ref already holds conv2 bias (+ nin bias when use_nin)
        o_ref[0] = (acc + sc + row_ref[...]).reshape(H, W, Cout).astype(o_ref.dtype)

    return kernel


# -----------------------------------------------------------------------------
# Wrappers
# -----------------------------------------------------------------------------
def _compiler_params():
    # Generation-aware VMEM budget: ~3/4 of physical, capped at 100 MiB
    # (~96 MiB on v5e/v6e's 128 MiB VMEM, ~48 MiB on v7x's 64 MiB).
    cap = 128 * 1024 * 1024
    try:
        cap = int(getattr(pltpu.get_tpu_info(), "vmem_capacity_bytes", cap))
    except Exception:
        pass
    limit = min(100 * 1024 * 1024, (cap * 3) // 4)
    return pltpu.CompilerParams(
        dimension_semantics=("parallel",),
        vmem_limit_bytes=int(limit))


def _group_factors(C, hw, num_groups=NUM_GROUPS):
    # (C, G) one-hot gather and (G, C) scaled scatter so that
    # row @ gs @ gb == per-group average broadcast back to channels.
    cpg = C // num_groups
    grp = jnp.arange(C, dtype=jnp.int32) // cpg
    gid = jnp.arange(num_groups, dtype=jnp.int32)
    gs = (grp[:, None] == gid[None, :]).astype(jnp.float32)          # (C, G)
    gb = (gid[:, None] == grp[None, :]).astype(jnp.float32) / float(hw * cpg)
    return gs, gb                                                     # (G, C)


def gn_swish_conv1_temb(x, gamma, beta, w_bands, bconv, tproj):
    N, H, W, Cin = x.shape
    Cout = w_bands.shape[-1]
    assert W % 8 == 0, "W must be a multiple of 8 (sublane tiling)"
    assert Cin % NUM_GROUPS == 0
    gs, gb = _group_factors(Cin, H * W)
    kernel = partial(gn_conv1_temb_kernel, H=H, W=W, Cin=Cin, Cout=Cout)
    return pl.pallas_call(
        kernel,
        out_shape=jax.ShapeDtypeStruct((N, H, W, Cout), x.dtype),
        grid=(N,),
        in_specs=[
            pl.BlockSpec((1, H, W, Cin), lambda n: (n, 0, 0, 0)),
            pl.BlockSpec((Cin, NUM_GROUPS), lambda n: (0, 0)),
            pl.BlockSpec((NUM_GROUPS, Cin), lambda n: (0, 0)),
            pl.BlockSpec((1, Cin), lambda n: (0, 0)),
            pl.BlockSpec((1, Cin), lambda n: (0, 0)),
            pl.BlockSpec((3, 3 * Cin, Cout), lambda n: (0, 0, 0)),
            pl.BlockSpec((1, Cout), lambda n: (0, 0)),
            pl.BlockSpec((1, 1, Cout), lambda n: (n, 0, 0)),
        ],
        out_specs=pl.BlockSpec((1, H, W, Cout), lambda n: (n, 0, 0, 0)),
        scratch_shapes=[pltpu.VMEM(((H + 2) * W, 3 * Cin), MXU_DTYPE)],
        compiler_params=_compiler_params(),
    )(x, gs, gb, gamma.reshape(1, Cin), beta.reshape(1, Cin), w_bands,
      bconv.reshape(1, Cout), tproj.reshape(N, 1, Cout))


def gn_swish_conv2_shortcut_add(h, gamma, beta, w_bands, bconv, x,
                                nin_w=None, nin_b=None):
    N, H, W, Cmid = h.shape
    Cin = x.shape[-1]
    Cout = w_bands.shape[-1]
    assert W % 8 == 0, "W must be a multiple of 8 (sublane tiling)"
    assert Cmid % NUM_GROUPS == 0
    use_nin = nin_w is not None
    gs, gb = _group_factors(Cmid, H * W)
    bias_row = bconv + (nin_b if use_nin else 0.0)   # fold conv2 + nin biases
    kernel = make_gn_conv2_res_kernel(H, W, Cmid, Cin, Cout, use_nin)
    in_specs = [
        pl.BlockSpec((1, H, W, Cmid), lambda n: (n, 0, 0, 0)),
        pl.BlockSpec((Cmid, NUM_GROUPS), lambda n: (0, 0)),
        pl.BlockSpec((NUM_GROUPS, Cmid), lambda n: (0, 0)),
        pl.BlockSpec((1, Cmid), lambda n: (0, 0)),
        pl.BlockSpec((1, Cmid), lambda n: (0, 0)),
        pl.BlockSpec((3, 3 * Cmid, Cout), lambda n: (0, 0, 0)),
        pl.BlockSpec((1, Cout), lambda n: (0, 0)),
        pl.BlockSpec((1, H, W, Cin), lambda n: (n, 0, 0, 0)),
    ]
    args = [h, gs, gb, gamma.reshape(1, Cmid), beta.reshape(1, Cmid), w_bands,
            bias_row.reshape(1, Cout), x]
    if use_nin:
        in_specs.append(pl.BlockSpec((Cin, Cout), lambda n: (0, 0)))
        args.append(nin_w)
    return pl.pallas_call(
        kernel,
        out_shape=jax.ShapeDtypeStruct((N, H, W, Cout), h.dtype),
        grid=(N,),
        in_specs=in_specs,
        out_specs=pl.BlockSpec((1, H, W, Cout), lambda n: (n, 0, 0, 0)),
        scratch_shapes=[pltpu.VMEM(((H + 2) * W, 3 * Cmid), MXU_DTYPE)],
        compiler_params=_compiler_params(),
    )(*args)


# -----------------------------------------------------------------------------
# Full ResnetBlock forward
# -----------------------------------------------------------------------------
def resnet_block_forward(x, temb, p):
    # x: (N, H, W, Cin) NHWC ; temb: (N, T)
    # temb projection precomputed once outside the grid (tiny matmul, plain JAX).
    tproj = jnp.dot(_swish_host(temb), p["temb_w"]) + p["temb_b"]     # (N, Cout)
    h = gn_swish_conv1_temb(x, p["norm1_gamma"], p["norm1_beta"],
                            p["conv1_w"], p["conv1_b"], tproj)
    out = gn_swish_conv2_shortcut_add(
        h, p["norm2_gamma"], p["norm2_beta"], p["conv2_w"], p["conv2_b"], x,
        p.get("nin_w"), p.get("nin_b"))
    # TODO(synk): conv_shortcut=True (3x3 shortcut conv) config is not wired;
    # only nin_shortcut (Cin != Cout) / identity (Cin == Cout) paths exist.
    # TODO(synk): for large H*W add a spatial (row-band) grid axis with a
    # 1-row halo + precomputed GN stats so per-step blocks fit v7x's 64 MiB VMEM.
    return out


def init_params(key, Cin, Cout, T):
    ks = jax.random.split(key, 12)
    p = {
        "norm1_gamma": 1.0 + 0.1 * jax.random.normal(ks[0], (Cin,), jnp.float32),
        "norm1_beta": 0.1 * jax.random.normal(ks[1], (Cin,), jnp.float32),
        # 3x3 conv weights in band layout (3, 3*Cin, Cout):
        # [dy, dx*Cin + ci, co] == HWIO[dy, dx, ci, co]; bf16 MXU operands.
        "conv1_w": (0.1 * jax.random.normal(ks[2], (3, 3 * Cin, Cout),
                                            jnp.float32)).astype(MXU_DTYPE),
        "conv1_b": 0.1 * jax.random.normal(ks[3], (Cout,), jnp.float32),
        "temb_w": 0.1 * jax.random.normal(ks[4], (T, Cout), jnp.float32),
        "temb_b": 0.1 * jax.random.normal(ks[5], (Cout,), jnp.float32),
        "norm2_gamma": 1.0 + 0.1 * jax.random.normal(ks[6], (Cout,), jnp.float32),
        "norm2_beta": 0.1 * jax.random.normal(ks[7], (Cout,), jnp.float32),
        "conv2_w": (0.1 * jax.random.normal(ks[8], (3, 3 * Cout, Cout),
                                            jnp.float32)).astype(MXU_DTYPE),
        "conv2_b": 0.1 * jax.random.normal(ks[9], (Cout,), jnp.float32),
    }
    if Cin != Cout:
        p["nin_w"] = (0.1 * jax.random.normal(ks[10], (Cin, Cout), jnp.float32)
                      ).astype(MXU_DTYPE)
        p["nin_b"] = 0.1 * jax.random.normal(ks[11], (Cout,), jnp.float32)
    return p


# -----------------------------------------------------------------------------
# Pure-JAX reference (correctness check; conv operands quantized to bf16 to
# match the kernel's MXU dtype, accumulation in f32).
# -----------------------------------------------------------------------------
def reference(x, temb, p, num_groups=NUM_GROUPS):
    def gn(v, gamma, beta):
        N, H, W, C = v.shape
        G = num_groups
        vg = v.reshape(N, H, W, G, C // G)
        mean = vg.mean(axis=(1, 2, 4), keepdims=True)
        var = vg.var(axis=(1, 2, 4), keepdims=True)
        vn = ((vg - mean) * lax.rsqrt(var + EPS)).reshape(N, H, W, C)
        return vn * gamma.reshape(1, 1, 1, C) + beta.reshape(1, 1, 1, C)

    def conv3(v, wb, b):
        Cout = wb.shape[-1]
        Cin = wb.shape[1] // 3
        w = wb.reshape(3, 3, Cin, Cout)                 # HWIO
        y = lax.conv_general_dilated(
            v.astype(MXU_DTYPE), w.astype(MXU_DTYPE), (1, 1), "SAME",
            dimension_numbers=("NHWC", "HWIO", "NHWC"),
            preferred_element_type=jnp.float32)
        return y + b.reshape(1, 1, 1, Cout)

    h = _swish_host(gn(x, p["norm1_gamma"], p["norm1_beta"]))
    h = conv3(h, p["conv1_w"], p["conv1_b"])
    tp = jnp.dot(_swish_host(temb), p["temb_w"]) + p["temb_b"]
    h = h + tp[:, None, None, :]
    h = _swish_host(gn(h, p["norm2_gamma"], p["norm2_beta"]))
    h = conv3(h, p["conv2_w"], p["conv2_b"])
    if "nin_w" in p:
        sc = jnp.einsum("nhwc,co->nhwo", x.astype(MXU_DTYPE), p["nin_w"],
                        preferred_element_type=jnp.float32)
        sc = sc + p["nin_b"].reshape(1, 1, 1, -1)
    else:
        sc = x
    return sc + h


if __name__ == "__main__":
    def run_case(case_key, N, H, W, Cin, Cout, T):
        kx, kt, kp = jax.random.split(case_key, 3)
        x = jax.random.normal(kx, (N, H, W, Cin), jnp.float32)   # NHWC
        temb = jax.random.normal(kt, (N, T), jnp.float32)
        params = init_params(kp, Cin, Cout, T)
        out = jax.block_until_ready(resnet_block_forward(x, temb, params))
        ref = jax.block_until_ready(reference(x, temb, params))
        assert out.shape == (N, H, W, Cout)
        err = float(jnp.max(jnp.abs(out - ref)))
        assert err < 2e-2, f"max abs err = {err}"

    key = jax.random.PRNGKey(0)
    k1, k2 = jax.random.split(key)
    # GroupNorm(32) requires channels divisible by 32.
    run_case(k1, N=2, H=8, W=8, Cin=32, Cout=64, T=64)   # NiN 1x1 shortcut path
    run_case(k2, N=2, H=8, W=8, Cin=32, Cout=32, T=64)   # identity shortcut path
    print("KERNEL_OK")
</pallas_src>

<mosaic_0001>
module attributes {stable_mosaic.version = 11 : i64} {
  func.func @gn_conv1_temb_kernel(%arg0: i32, %arg1: memref<1x8x8x32xf32, #tpu.memory_space<vmem>>, %arg2: memref<32x32xf32, #tpu.memory_space<vmem>>, %arg3: memref<32x32xf32, #tpu.memory_space<vmem>>, %arg4: memref<1x32xf32, #tpu.memory_space<vmem>>, %arg5: memref<1x32xf32, #tpu.memory_space<vmem>>, %arg6: memref<3x96x64xbf16, #tpu.memory_space<vmem>>, %arg7: memref<1x64xf32, #tpu.memory_space<vmem>>, %arg8: memref<1x1x64xf32, #tpu.memory_space<vmem>>, %arg9: memref<1x8x8x64xf32, #tpu.memory_space<vmem>>, %arg10: memref<80x96xbf16, #tpu.memory_space<vmem>>) attributes {dimension_semantics = [#tpu.dimension_semantics<parallel>], iteration_bounds = array<i64: 2>, scalar_prefetch = 0 : i64, scratch_operands = 1 : i64, tpu.core_type = #tpu.core_type<tc>, window_params = [{transform_indices = @transform_0, window_bounds = array<i64: 1, 8, 8, 32>}, {pipeline_mode = #tpu.pipeline_mode<synchronous>, transform_indices = @transform_1, window_bounds = array<i64: 32, 32>}, {pipeline_mode = #tpu.pipeline_mode<synchronous>, transform_indices = @transform_2, window_bounds = array<i64: 32, 32>}, {pipeline_mode = #tpu.pipeline_mode<synchronous>, transform_indices = @transform_3, window_bounds = array<i64: 1, 32>}, {pipeline_mode = #tpu.pipeline_mode<synchronous>, transform_indices = @transform_4, window_bounds = array<i64: 1, 32>}, {pipeline_mode = #tpu.pipeline_mode<synchronous>, transform_indices = @transform_5, window_bounds = array<i64: 3, 96, 64>}, {pipeline_mode = #tpu.pipeline_mode<synchronous>, transform_indices = @transform_6, window_bounds = array<i64: 1, 64>}, {transform_indices = @transform_7, window_bounds = array<i64: 1, 1, 64>}, {transform_indices = @transform_8, window_bounds = array<i64: 1, 8, 8, 64>}]} {
    %c0 = arith.constant 0 : index
    %c0_0 = arith.constant 0 : index
    %c0_1 = arith.constant 0 : index
    %c0_2 = arith.constant 0 : index
    %0 = vector.load %arg1[%c0, %c0_0, %c0_1, %c0_2] : memref<1x8x8x32xf32, #tpu.memory_space<vmem>>, vector<1x8x8x32xf32>
    %1 = vector.shape_cast %0 : vector<1x8x8x32xf32> to vector<8x8x32xf32>
    %2 = vector.shape_cast %1 : vector<8x8x32xf32> to vector<64x32xf32>
    %c0_3 = arith.constant 0 : index
    %c0_4 = arith.constant 0 : index
    %3 = vector.load %arg2[%c0_3, %c0_4] : memref<32x32xf32, #tpu.memory_space<vmem>>, vector<32x32xf32>
    %c0_5 = arith.constant 0 : index
    %c0_6 = arith.constant 0 : index
    %4 = vector.load %arg3[%c0_5, %c0_6] : memref<32x32xf32, #tpu.memory_space<vmem>>, vector<32x32xf32>
    %c0_7 = arith.constant 0 : index
    %c0_8 = arith.constant 0 : index
    %5 = vector.load %arg4[%c0_7, %c0_8] : memref<1x32xf32, #tpu.memory_space<vmem>>, vector<1x32xf32>
    %c0_9 = arith.constant 0 : index
    %c0_10 = arith.constant 0 : index
    %6 = vector.load %arg5[%c0_9, %c0_10] : memref<1x32xf32, #tpu.memory_space<vmem>>, vector<1x32xf32>
    %cst = arith.constant dense<0.000000e+00> : vector<32xf32>
    %7 = vector.multi_reduction <add>, %2, %cst [0] : vector<64x32xf32> to vector<32xf32>
    %8 = vector.shape_cast %7 : vector<32xf32> to vector<1x32xf32>
    %9 = arith.mulf %2, %2 : vector<64x32xf32>
    %cst_11 = arith.constant dense<0.000000e+00> : vector<32xf32>
    %10 = vector.multi_reduction <add>, %9, %cst_11 [0] : vector<64x32xf32> to vector<32xf32>
    %11 = vector.shape_cast %10 : vector<32xf32> to vector<1x32xf32>
    %cst_12 = arith.constant dense<0.000000e+00> : vector<1x32xf32>
    %12 = tpu.matmul %8, %3, %cst_12 {dimension_numbers = #tpu.dot_dimension_numbers<[1], [0], [0], [1], [0, 0, 1, 1], [], []>} : vector<1x32xf32>, vector<32x32xf32>, vector<1x32xf32> -> vector<1x32xf32>
    %cst_13 = arith.constant dense<0.000000e+00> : vector<1x32xf32>
    %13 = tpu.matmul %12, %4, %cst_13 {dimension_numbers = #tpu.dot_dimension_numbers<[1], [0], [0], [1], [0, 0, 1, 1], [], []>} : vector<1x32xf32>, vector<32x32xf32>, vector<1x32xf32> -> vector<1x32xf32>
    %cst_14 = arith.constant dense<0.000000e+00> : vector<1x32xf32>
    %14 = tpu.matmul %11, %3, %cst_14 {dimension_numbers = #tpu.dot_dimension_numbers<[1], [0], [0], [1], [0, 0, 1, 1], [], []>} : vector<1x32xf32>, vector<32x32xf32>, vector<1x32xf32> -> vector<1x32xf32>
    %cst_15 = arith.constant dense<0.000000e+00> : vector<1x32xf32>
    %15 = tpu.matmul %14, %4, %cst_15 {dimension_numbers = #tpu.dot_dimension_numbers<[1], [0], [0], [1], [0, 0, 1, 1], [], []>} : vector<1x32xf32>, vector<32x32xf32>, vector<1x32xf32> -> vector<1x32xf32>
    %16 = arith.mulf %13, %13 : vector<1x32xf32>
    %17 = arith.subf %15, %16 : vector<1x32xf32>
    %cst_16 = arith.constant 9.99999997E-7 : f32
    %18 = vector.broadcast %cst_16 : f32 to vector<1x32xf32>
    %19 = arith.addf %17, %18 : vector<1x32xf32>
    %20 = math.rsqrt %19 : vector<1x32xf32>
    %21 = arith.mulf %20, %5 : vector<1x32xf32>
    %22 = arith.mulf %13, %21 : vector<1x32xf32>
    %23 = arith.subf %6, %22 : vector<1x32xf32>
    %24 = vector.broadcast %21 : vector<1x32xf32> to vector<64x32xf32>
    %25 = arith.mulf %2, %24 : vector<64x32xf32>
    %26 = vector.broadcast %23 : vector<1x32xf32> to vector<64x32xf32>
    %27 = arith.addf %25, %26 : vector<64x32xf32>
    %cst_17 = arith.constant 5.000000e-01 : f32
    %28 = vector.broadcast %cst_17 : f32 to vector<64x32xf32>
    %29 = arith.mulf %28, %27 : vector<64x32xf32>
    %cst_18 = arith.constant 5.000000e-01 : f32
    %30 = vector.broadcast %cst_18 : f32 to vector<64x32xf32>
    %31 = arith.mulf %30, %27 : vector<64x32xf32>
    %32 = math.tanh %31 : vector<64x32xf32>
    %cst_19 = arith.constant 1.000000e+00 : f32
    %33 = vector.broadcast %cst_19 : f32 to vector<64x32xf32>
    %34 = arith.addf %33, %32 : vector<64x32xf32>
    %35 = arith.mulf %29, %34 : vector<64x32xf32>
    %36 = tpu.iota {dimensions = array<i32: 1>} : vector<8x8x32xi32>
    %37 = vector.shape_cast %36 : vector<8x8x32xi32> to vector<64x32xi32>
    %c0_i32 = arith.constant 0 : i32
    %38 = vector.broadcast %c0_i32 : i32 to vector<64x32xi32>
    %39 = arith.cmpi eq, %37, %38 : vector<64x32xi32>
    %c1_i32 = arith.constant 1 : i32
    %40 = tpu.dynamic_rotate %35 by %c1_i32 dim 0 : vector<64x32xf32>, i32 -> vector<64x32xf32>
    %cst_20 = arith.constant 0.000000e+00 : f32
    %41 = vector.broadcast %cst_20 : f32 to vector<64x32xf32>
    %42 = arith.select %39, %41, %40 : vector<64x32xi1>, vector<64x32xf32>
    %c7_i32 = arith.constant 7 : i32
    %43 = vector.broadcast %c7_i32 : i32 to vector<64x32xi32>
    %44 = arith.cmpi eq, %37, %43 : vector<64x32xi32>
    %c63_i32 = arith.constant 63 : i32
    %45 = tpu.dynamic_rotate %35 by %c63_i32 dim 0 : vector<64x32xf32>, i32 -> vector<64x32xf32>
    %cst_21 = arith.constant 0.000000e+00 : f32
    %46 = vector.broadcast %cst_21 : f32 to vector<64x32xf32>
    %47 = arith.select %44, %46, %45 : vector<64x32xi1>, vector<64x32xf32>
    %cst_22 = arith.constant 0.000000e+00 : bf16
    %48 = vector.broadcast %cst_22 : bf16 to vector<8x96xbf16>
    %c0_23 = arith.constant 0 : index
    %c0_24 = arith.constant 0 : index
    %49 = vector.load %arg10[%c0_23, %c0_24] : memref<80x96xbf16, #tpu.memory_space<vmem>>, vector<8x96xbf16>
    tpu.vector_store %arg10[%c0_23, %c0_24], %48 {strides = array<i32>} : memref<80x96xbf16, #tpu.memory_space<vmem>>, vector<8x96xbf16>,
    %c72 = arith.constant 72 : index
    %c0_25 = arith.constant 0 : index
    %50 = vector.load %arg10[%c72, %c0_25] : memref<80x96xbf16, #tpu.memory_space<vmem>>, vector<8x96xbf16>
    tpu.vector_store %arg10[%c72, %c0_25], %48 {strides = array<i32>} : memref<80x96xbf16, #tpu.memory_space<vmem>>, vector<8x96xbf16>,
    %51 = arith.truncf %42 : vector<64x32xf32> to vector<64x32xbf16>
    %c8 = arith.constant 8 : index
    %c0_26 = arith.constant 0 : index
    %52 = vector.load %arg10[%c8, %c0_26] : memref<80x96xbf16, #tpu.memory_space<vmem>>, vector<64x32xbf16>
    tpu.vector_store %arg10[%c8, %c0_26], %51 {strides = array<i32>} : memref<80x96xbf16, #tpu.memory_space<vmem>>, vector<64x32xbf16>,
    %53 = arith.truncf %35 : vector<64x32xf32> to vector<64x32xbf16>
    %c8_27 = arith.constant 8 : index
    %c32 = arith.constant 32 : index
    %54 = vector.load %arg10[%c8_27, %c32] : memref<80x96xbf16, #tpu.memory_space<vmem>>, vector<64x32xbf16>
    tpu.vector_store %arg10[%c8_27, %c32], %53 {strides = array<i32>} : memref<80x96xbf16, #tpu.memory_space<vmem>>, vector<64x32xbf16>,
    %55 = arith.truncf %47 : vector<64x32xf32> to vector<64x32xbf16>
    %c8_28 = arith.constant 8 : index
    %c64 = arith.constant 64 : index
    %56 = vector.load %arg10[%c8_28, %c64] : memref<80x96xbf16, #tpu.memory_space<vmem>>, vector<64x32xbf16>
    tpu.vector_store %arg10[%c8_28, %c64], %55 {strides = array<i32>} : memref<80x96xbf16, #tpu.memory_space<vmem>>, vector<64x32xbf16>,
    %cst_29 = arith.constant 0.000000e+00 : f32
    %57 = vector.broadcast %cst_29 : f32 to vector<64x64xf32>
    %c0_30 = arith.constant 0 : index
    %c0_31 = arith.constant 0 : index
    %58 = vector.load %arg10[%c0_30, %c0_31] : memref<80x96xbf16, #tpu.memory_space<vmem>>, vector<64x96xbf16>
    %c0_32 = arith.constant 0 : index
    %c0_33 = arith.constant 0 : index
    %c0_34 = arith.constant 0 : index
    %59 = vector.load %arg6[%c0_32, %c0_33, %c0_34] : memref<3x96x64xbf16, #tpu.memory_space<vmem>>, vector<1x96x64xbf16>
    %60 = vector.shape_cast %59 : vector<1x96x64xbf16> to vector<96x64xbf16>
    %cst_35 = arith.constant dense<0.000000e+00> : vector<64x64xf32>
    %61 = tpu.matmul %58, %60, %cst_35 {dimension_numbers = #tpu.dot_dimension_numbers<[1], [0], [0], [1], [0, 0, 1, 1], [], []>} : vector<64x96xbf16>, vector<96x64xbf16>, vector<64x64xf32> -> vector<64x64xf32>
    %62 = arith.addf %57, %61 : vector<64x64xf32>
    %c8_36 = arith.constant 8 : index
    %c0_37 = arith.constant 0 : index
    %63 = vector.load %arg10[%c8_36, %c0_37] : memref<80x96xbf16, #tpu.memory_space<vmem>>, vector<64x96xbf16>
    %c1 = arith.constant 1 : index
    %c0_38 = arith.constant 0 : index
    %c0_39 = arith.constant 0 : index
    %64 = vector.load %arg6[%c1, %c0_38, %c0_39] : memref<3x96x64xbf16, #tpu.memory_space<vmem>>, vector<1x96x64xbf16>
    %65 = vector.shape_cast %64 : vector<1x96x64xbf16> to vector<96x64xbf16>
    %cst_40 = arith.constant dense<0.000000e+00> : vector<64x64xf32>
    %66 = tpu.matmul %63, %65, %cst_40 {dimension_numbers = #tpu.dot_dimension_numbers<[1], [0], [0], [1], [0, 0, 1, 1], [], []>} : vector<64x96xbf16>, vector<96x64xbf16>, vector<64x64xf32> -> vector<64x64xf32>
    %67 = arith.addf %62, %66 : vector<64x64xf32>
    %c16 = arith.constant 16 : index
    %c0_41 = arith.constant 0 : index
    %68 = vector.load %arg10[%c16, %c0_41] : memref<80x96xbf16, #tpu.memory_space<vmem>>, vector<64x96xbf16>
    %c2 = arith.constant 2 : index
    %c0_42 = arith.constant 0 : index
    %c0_43 = arith.constant 0 : index
    %69 = vector.load %arg6[%c2, %c0_42, %c0_43] : memref<3x96x64xbf16, #tpu.memory_space<vmem>>, vector<1x96x64xbf16>
    %70 = vector.shape_cast %69 : vector<1x96x64xbf16> to vector<96x64xbf16>
    %cst_44 = arith.constant dense<0.000000e+00> : vector<64x64xf32>
    %71 = tpu.matmul %68, %70, %cst_44 {dimension_numbers = #tpu.dot_dimension_numbers<[1], [0], [0], [1], [0, 0, 1, 1], [], []>} : vector<64x96xbf16>, vector<96x64xbf16>, vector<64x64xf32> -> vector<64x64xf32>
    %72 = arith.addf %67, %71 : vector<64x64xf32>
    %c0_45 = arith.constant 0 : index
    %c0_46 = arith.constant 0 : index
    %73 = vector.load %arg7[%c0_45, %c0_46] : memref<1x64xf32, #tpu.memory_space<vmem>>, vector<1x64xf32>
    %c0_47 = arith.constant 0 : index
    %c0_48 = arith.constant 0 : index
    %c0_49 = arith.constant 0 : index
    %74 = vector.load %arg8[%c0_47, %c0_48, %c0_49] : memref<1x1x64xf32, #tpu.memory_space<vmem>>, vector<1x1x64xf32>
    %75 = vector.shape_cast %74 : vector<1x1x64xf32> to vector<1x64xf32>
    %76 = arith.addf %73, %75 : vector<1x64xf32>
    %77 = vector.broadcast %76 : vector<1x64xf32> to vector<64x64xf32>
    %78 = arith.addf %72, %77 : vector<64x64xf32>
    %79 = vector.shape_cast %78 : vector<64x64xf32> to vector<8x8x64xf32>
    %c0_50 = arith.constant 0 : index
    %c0_51 = arith.constant 0 : index
    %c0_52 = arith.constant 0 : index
    %c0_53 = arith.constant 0 : index
    %80 = vector.load %arg9[%c0_50, %c0_51, %c0_52, %c0_53] : memref<1x8x8x64xf32, #tpu.memory_space<vmem>>, vector<1x8x8x64xf32>
    %81 = vector.shape_cast %80 : vector<1x8x8x64xf32> to vector<8x8x64xf32>
    %82 = vector.shape_cast %79 : vector<8x8x64xf32> to vector<1x8x8x64xf32>
    tpu.vector_store %arg9[%c0_50, %c0_51, %c0_52, %c0_53], %82 {strides = array<i32>} : memref<1x8x8x64xf32, #tpu.memory_space<vmem>>, vector<1x8x8x64xf32>,
    return
  }
  func.func @transform_0(%arg0: i32) -> (i32, i32, i32, i32) {
    %c0_i32 = arith.constant 0 : i32
    %c0_i32_0 = arith.constant 0 : i32
    %c0_i32_1 = arith.constant 0 : i32
    %c0_i32_2 = arith.constant 0 : i32
    return %arg0, %c0_i32, %c0_i32_0, %c0_i32_1 : i32, i32, i32, i32
  }
  func.func @transform_1(%arg0: i32) -> (i32, i32) {
    %c0_i32 = arith.constant 0 : i32
    %c0_i32_0 = arith.constant 0 : i32
    %c0_i32_1 = arith.constant 0 : i32
    return %c0_i32, %c0_i32_0 : i32, i32
  }
  func.func @transform_2(%arg0: i32) -> (i32, i32) {
    %c0_i32 = arith.constant 0 : i32
    %c0_i32_0 = arith.constant 0 : i32
    %c0_i32_1 = arith.constant 0 : i32
    return %c0_i32, %c0_i32_0 : i32, i32
  }
  func.func @transform_3(%arg0: i32) -> (i32, i32) {
    %c0_i32 = arith.constant 0 : i32
    %c0_i32_0 = arith.constant 0 : i32
    %c0_i32_1 = arith.constant 0 : i32
    return %c0_i32, %c0_i32_0 : i32, i32
  }
  func.func @transform_4(%arg0: i32) -> (i32, i32) {
    %c0_i32 = arith.constant 0 : i32
    %c0_i32_0 = arith.constant 0 : i32
    %c0_i32_1 = arith.constant 0 : i32
    return %c0_i32, %c0_i32_0 : i32, i32
  }
  func.func @transform_5(%arg0: i32) -> (i32, i32, i32) {
    %c0_i32 = arith.constant 0 : i32
    %c0_i32_0 = arith.constant 0 : i32
    %c0_i32_1 = arith.constant 0 : i32
    %c0_i32_2 = arith.constant 0 : i32
    return %c0_i32, %c0_i32_0, %c0_i32_1 : i32, i32, i32
  }
  func.func @transform_6(%arg0: i32) -> (i32, i32) {
    %c0_i32 = arith.constant 0 : i32
    %c0_i32_0 = arith.constant 0 : i32
    %c0_i32_1 = arith.constant 0 : i32
    return %c0_i32, %c0_i32_0 : i32, i32
  }
  func.func @transform_7(%arg0: i32) -> (i32, i32, i32) {
    %c0_i32 = arith.constant 0 : i32
    %c0_i32_0 = arith.constant 0 : i32
    %c0_i32_1 = arith.constant 0 : i32
    return %arg0, %c0_i32, %c0_i32_0 : i32, i32, i32
  }
  func.func @transform_8(%arg0: i32) -> (i32, i32, i32, i32) {
    %c0_i32 = arith.constant 0 : i32
    %c0_i32_0 = arith.constant 0 : i32
    %c0_i32_1 = arith.constant 0 : i32
    %c0_i32_2 = arith.constant 0 : i32
    return %arg0, %c0_i32, %c0_i32_0, %c0_i32_1 : i32, i32, i32, i32
  }
}

</mosaic_0001>

<bundles_post_ra>
// kernel: tpu_custom_call.1
= control target key start
LH: loop header
LB: loop body
LE: loop exit
PB: predicated region body
PF: predicated region fallthrough
CT: control target
= control target key end

     0   :  { %13 = vsyncpa [#allocation4], 0  ;;  %s2527_s0 = inlined_call_operand.vmem [shape: f32[2,8,8,32], index: 0, kind: input, shape index: {}]   ;;  %s2528_s1 = inlined_call_operand.vmem [shape: f32[32,32], index: 1, kind: input, shape index: {}]   ;;  %s2529_s2 = inlined_call_operand.vmem [shape: f32[32,32], index: 2, kind: input, shape index: {}]   ;;  %s2530_s3 = inlined_call_operand.vmem [shape: f32[1,32], index: 3, kind: input, shape index: {}]   ;;  %s2531_s4 = inlined_call_operand.vmem [shape: f32[1,32], index: 4, kind: input, shape index: {}]   ;;  %s2532_s5 = inlined_call_operand.vmem [shape: bf16[3,96,64], index: 5, kind: input, shape index: {}]   ;;  %s2533_s6 = inlined_call_operand.vmem [shape: f32[1,64], index: 6, kind: input, shape index: {}]   ;;  %s2534_s7 = inlined_call_operand.vmem [shape: f32[2,1,64], index: 7, kind: input, shape index: {}]   ;;  %s2535_s8 = inlined_call_operand.hbm [shape: f32[2,8,8,64], index: 8, kind: output, shape index: {}]  }
   0x1   :  { %15 = vsyncpa [#allocation4 + $0x1], 0  ;;  %s2010_s27 = smov 0   ;;  %s2012_s28 = smov 0  }
   0x2   :  { %s2014_s29 = smov 0   ;;  %s2016_s30 = smov 0  }
   0x3 LB: > { %s2031_s9 = sadd.s32 4294967295, %s1955_s30   ;;  %s1517_s10 = sadd.s32 4294967294, %s1955_s30   ;;  %s1955_s30 = sphi %s2016_s30, %s2541_s30   ;;  %s1951_s29 = sphi %s2014_s29, %s2540_s29   ;;  %s1947_s28 = sphi %s2012_s28, %s2539_s28   ;;  %s1943_s27 = sphi %s2010_s27, %s2538_s27  }
   0x4   : > { %s2035_s11 = sadd.s32 1, %s1955_s30   ;;  %s206_s12 = sadd.s32 1, %s1951_s29 }
   0x5   : > { %s203_s13 = ssub.s32 %s1955_s30, %s2035_s11  ;;  %p216_p0 = scmp.ne.s32.totalorder %s1951_s29, %s1947_s28 }
   0x6   : > { %p204_p1 = scmp.eq.s32.totalorder %s203_s13, 0  ;;  %p217_p2 = scmp.eq.s32.totalorder %s2031_s9, 1 }
   0x7   : > { %p222_p3 = scmp.ne.s32.totalorder %s1947_s28, %s1943_s27  ;;  %p223_p4 = scmp.eq.s32.totalorder %s1517_s10, 1 }
   0x8   : > { %s2046_s14 = scalar_select %p204_p1, %s1951_s29, %s206_s12  }
   0x9   : > { %p2048_p5 = por %p217_p2, %p216_p0  ;;  %p2052_p6 = por %p223_p4, %p222_p3 }
   0xa   : > { %p1520_p7 = scmp.ge.s32.totalorder %s1955_s30, 1  ;;  %p273_p8 = scmp.lt.s32.totalorder %s1955_s30, 3 }
   0xc   : > { %p274_p9 = pnand %p1520_p7, %p273_p8 }
   0xd   : > { %p310_p10 = scmp.lt.s32.totalorder (!%p274_p9), %s2031_s9, 1  ;;  %s1959_s21 = smov (!%p274_p9), 32  }
   0xe   : > { %277 = sbr.rel (%p274_p9) target bundleno = 882 (0x372), region = 52  ;;  %s307_s25 = sand.u32 (!%p274_p9), 1, %s1947_s28  }
   0xf   : > { %s1648_s10 = sshll.u32 (!%p274_p9), %s2031_s9, 10  ;;  %s1962_s20 = smov (!%p274_p9), [#allocation3]  }
  0x10   : > { %s2477_s18 = scalar_lea.hbm (!%p274_p9), %s2535_s8, %s1648_s10 }
  0x13   : > { %v330_v0 = vld [vmem:[%s2528_s1 + $0x18] sm:$0xff]  ;;  %v1957_v1 = vmov 0.0   ;;  %v329_v2 = vld [vmem:[%s2528_s1 + $0x10] sm:$0xff]  ;;  %v328_v3 = vld [vmem:[%s2528_s1 + $0x8] sm:$0xff]  ;;  %s2071_s23 = scalar_select %p310_p10, %s2031_s9, 1  ;;  %vm1958_vm0 = vmmov 0  }
  0x14   : > { %1699 = vmatprep.subr.mxu1 %v1957_v1  ;;  %1721 = vmatprep.subr.mxu0 %v1957_v1  ;;  %v327_v4 = vld [vmem:[%s2528_s1] sm:$0xff]  ;;  %vm337_vm1 = vcmask 261120   ;;  %v334_v61 = vld [vmem:[%s2529_s2 + $0x18] sm:$0xff]  ;;  %v333_v63 = vld [vmem:[%s2529_s2 + $0x10] sm:$0xff]  ;;  %vm834_vm6 = vcmask 257024   ;;  %vm799_vm7 = vcmask 781312  }
  0x15   : > { %1700 = vmatpush3.msra.mxu1 %v330_v0  ;;  %1722 = vmatpush3.msra.mxu0 %v330_v0  ;;  %s1623_s26 = sshll.u32 %s2071_s23, 6  ;;  %vm891_vm8 = vcmask 519424   ;;  %vm948_vm9 = vcmask 781824   ;;  %vm1047_vm10 = vcmask 785408   ;;  %vm1423_vm11 = vcmask 523264   ;;  %s2487_s9 = scalar_lea.sflag [#allocation4], %s307_s25 }
  0x16   : > { %1701 = vmatprep.subr.mxu1 %v1957_v1  ;;  %1707 = vmatprep.mubr.msk.f32.mxu1 %vm1958_vm0, %v1957_v1  ;;  %s314_s13 = scalar_lea.vmem %s2527_s0, %s1623_s26 }
  0x17   : > { %1702 = vmatpush3.msra.mxu1 %v329_v2  ;;  %1723 = vmatprep.subr.mxu0 %v1957_v1  ;;  %v2085_v5 = vld [vmem:[%s314_s13] sm:$0xff]  ;;  %v2087_v6 = vld [vmem:[%s314_s13 + $0x8] sm:$0xff]  ;;  %v2089_v7 = vld [vmem:[%s314_s13 + $0x10] sm:$0xff] }
  0x18   : > { %1703 = vmatprep.subr.mxu1 %v1957_v1  ;;  %1724 = vmatpush3.msra.mxu0 %v329_v2  ;;  %v2093_v8 = vld [vmem:[%s314_s13 + $0x18] sm:$0xff]  ;;  %v2095_v9 = vld [vmem:[%s314_s13 + $0x20] sm:$0xff]  ;;  %v2097_v10 = vld [vmem:[%s314_s13 + $0x28] sm:$0xff]  ;;  %v338_v11 = vsel %vm337_vm1, %v2085_v5, 0.0  ;;  %v339_v12 = vsel %vm337_vm1, %v2087_v6, 0.0  ;;  %v341_v13 = vsel %vm337_vm1, %v2089_v7, 0.0  ;;  %v359_v14 = vmul.f32 %v2085_v5, %v2085_v5 }
  0x19   : > { %1704 = vmatpush3.msra.mxu1 %v328_v3  ;;  %1725 = vmatprep.subr.mxu0 %v1957_v1  ;;  %v2107_v15 = vld [vmem:[%s314_s13 + $0x30] sm:$0xff]  ;;  %v2109_v16 = vld [vmem:[%s314_s13 + $0x38] sm:$0xff]  ;;  %v340_v17 = vadd.f32 %v339_v12, %v338_v11  ;;  %v343_v18 = vsel %vm337_vm1, %v2093_v8, 0.0  ;;  %v345_v19 = vsel %vm337_vm1, %v2095_v9, 0.0  ;;  %v347_v20 = vsel %vm337_vm1, %v2097_v10, 0.0  ;;  %v332_v2 = vld [vmem:[%s2529_s2 + $0x8] sm:$0xff] }
  0x1a   : > { %1705 = vmatprep.subr.mxu1 %v1957_v1  ;;  %1726 = vmatpush3.msra.mxu0 %v328_v3  ;;  %v360_v21 = vmul.f32 %v2087_v6, %v2087_v6  ;;  %v361_v22 = vmul.f32 %v2089_v7, %v2089_v7  ;;  %v362_v24 = vmul.f32 %v2093_v8, %v2093_v8  ;;  %v367_v27 = vsel %vm337_vm1, %v359_v14, 0.0  ;;  %v331_v3 = vld [vmem:[%s2529_s2] sm:$0xff]  ;;  %v1849_v14 = vld [vmem:[%s2532_s5 + $0x58] sm:$0xff]   ;;  %s1960_s13 = smov 64  }
  0x1b   : > { %1706 = vmatpush3.msra.mxu1 %v327_v4  ;;  %1727 = vmatprep.subr.mxu0 %v1957_v1  ;;  %v342_v23 = vadd.f32 %v341_v13, %v340_v17  ;;  %v363_v25 = vmul.f32 %v2095_v9, %v2095_v9  ;;  %v364_v26 = vmul.f32 %v2097_v10, %v2097_v10  ;;  %v349_v30 = vsel %vm337_vm1, %v2107_v15, 0.0  ;;  %v1850_v17 = vld [vmem:[%s2532_s5 + $0x28] sm:$0xff]  }
  0x1c   : > { %1728 = vmatpush3.msra.mxu0 %v327_v4  ;;  %1729 = vmatprep.mubr.msk.f32.mxu0 %vm1958_vm0, %v1957_v1  ;;  %v368_v28 = vsel %vm337_vm1, %v360_v21, 0.0  ;;  %v370_v32 = vsel %vm337_vm1, %v361_v22, 0.0  ;;  %v351_v33 = vsel %vm337_vm1, %v2109_v16, 0.0  ;;  %v372_v34 = vsel %vm337_vm1, %v362_v24, 0.0 }
  0x1d   : > { %1710 = vmatprep.subr.mxu1 %v1957_v1  ;;  %v344_v29 = vadd.f32 %v343_v18, %v342_v23  ;;  %v369_v31 = vadd.f32 %v368_v28, %v367_v27  ;;  %v374_v35 = vsel %vm337_vm1, %v363_v25, 0.0  ;;  %v376_v36 = vsel %vm337_vm1, %v364_v26, 0.0  ;;  %1743 = vmatprep.subr.bf16.mxu0 %v1849_v14  ;;  %v335_v26 = vld [vmem:[%s2530_s3] sm:$0x1] }
  0x1e   : > { %v365_v39 = vmul.f32 %v2107_v15, %v2107_v15  ;;  %v366_v42 = vmul.f32 %v2109_v16, %v2109_v16  ;;  %v687_v24 = vlaneseq }
  0x1f   : > { %v346_v37 = vadd.f32 %v345_v19, %v344_v29  ;;  %v371_v38 = vadd.f32 %v370_v32, %v369_v31 }
  0x20   : > { %v378_v45 = vsel %vm337_vm1, %v365_v39, 0.0  ;;  %v380_v48 = vsel %vm337_vm1, %v366_v42, 0.0  ;;  %v2180_v25 = vshrl.u32 %v687_v24, 7  ;;  %v1858_v24 = vld [vmem:[%s2532_s5 + $0x8] sm:$0xff]  }
  0x21   : > { %v348_v40 = vadd.f32 %v347_v20, %v346_v37  ;;  %v373_v41 = vadd.f32 %v372_v34, %v371_v38 }
  0x22   : > { %v2186_v27 = vsub.s32 0, %v2180_v25  ;;  %vm773_vm2 = vcmp.eq.s32.totalorder %v2180_v25, 7  ;;  %vm782_vm3 = vcmp.lt.s32.totalorder %v2180_v25, 7  ;;  %vm756_vm4 = vcmp.lt.s32.totalorder %v2180_v25, 1 }
  0x23   : > { %v350_v43 = vadd.f32 %v349_v30, %v348_v40  ;;  %v375_v44 = vadd.f32 %v374_v35, %v373_v41  ;;  %v336_v30 = vld [vmem:[%s2531_s4] sm:$0x1]  ;;  %vm747_vm5 = vcmp.eq.s32.totalorder %v2180_v25, 0 }
  0x25   : > { %v352_v46 = vadd.f32 %v351_v33, %v350_v43  ;;  %v377_v47 = vadd.f32 %v376_v36, %v375_v44 }
  0x27   : > { %v353_v49 = vrot.slane %v352_v46, 4  ;;  %v379_v50 = vadd.f32 %v378_v45, %v377_v47 }
  0x29   : > { %v354_v51 = vadd.f32 %v353_v49, %v352_v46  ;;  %v381_v52 = vadd.f32 %v380_v48, %v379_v50 }
  0x2b   : > { %v355_v53 = vrot.slane %v354_v51, 2  ;;  %v382_v54 = vrot.slane %v381_v52, 4 }
  0x2d   : > { %v356_v55 = vadd.f32 %v355_v53, %v354_v51  ;;  %v383_v56 = vadd.f32 %v382_v54, %v381_v52  ;;  %v1852_v52 = vld [vmem:[%s2532_s5 + $0x20] sm:$0xff]   ;;  %v1853_v53 = vld [vmem:[%s2532_s5 + $0x48] sm:$0xff]   ;;  %v1854_v54 = vld [vmem:[%s2532_s5 + $0x18] sm:$0xff]  }
  0x2f   : > { %v357_v57 = vrot.slane %v356_v55, 1  ;;  %v384_v58 = vrot.slane %v383_v56, 2 }
  0x31   : > { %v358_v59 = vadd.f32 %v357_v57, %v356_v55  ;;  %v385_v60 = vadd.f32 %v384_v58, %v383_v56 }
  0x33   : > { %1708 = vmatmul.mubr.msk.f32.vlgmr.msra.gmra.mxu1 %vm337_vm1, %v358_v59  ;;  %v386_v62 = vrot.slane %v385_v60, 1 }
  0x34   : > { %1711 = vmatpush3.msra.mxu1 %v334_v61  ;;  %1718 = vmatprep.mubr.msk.f32.mxu1 %vm1958_vm0, %v1957_v1 }
  0x35   : > { %v387_v0 = vadd.f32 %v386_v62, %v385_v60  ;;  %1712 = vmatprep.subr.mxu1 %v1957_v1 }
  0x36   : > { %1713 = vmatpush3.msra.mxu1 %v333_v63 }
  0x37   : > { %1730 = vmatmul.mubr.msk.f32.vlgmr.msra.gmra.mxu0 %vm337_vm1, %v387_v0  ;;  %1714 = vmatprep.subr.mxu1 %v1957_v1  ;;  %v1856_v0 = vld [vmem:[%s2532_s5 + $0x10] sm:$0xff]  }
  0x38   : > { %1715 = vmatpush3.msra.mxu1 %v332_v2  ;;  %1744 = vmatpush3.bf16.msra.mxu0 %v1849_v14 }
  0x39   : > { %1716 = vmatprep.subr.mxu1 %v1957_v1 }
  0x3a   : > { %1717 = vmatpush3.msra.mxu1 %v331_v3 }
  0x3b   : > { %1732 = vmatprep.subr.mxu1 %v1957_v1 }
  0xf3   : > { %v457_v4 = vpop.f32.mrf.mxu1 }
  0xf4   : > { %1719 = vmatmul.mubr.msk.f32.vlgmr.msra.gmra.mxu1 %vm337_vm1, %v457_v4 }
  0xf5   : > { %1733 = vmatpush3.msra.mxu1 %v334_v61  ;;  %v1709_v11 = vpop.f32.mrf.mxu1  ;;  %1740 = vmatprep.mubr.msk.f32.mxu1 %vm1958_vm0, %v1957_v1 }
  0xf6   : > { %1734 = vmatprep.subr.mxu1 %v1957_v1 }
  0xf7   : > { %1735 = vmatpush3.msra.mxu1 %v333_v63  ;;  %v603_v12 = vpop.f32.mrf.mxu0  ;;  %v1855_v63 = vld [vmem:[%s2532_s5 + $0x40] sm:$0xff]  }
  0xf8   : > { %1736 = vmatprep.subr.mxu1 %v1957_v1 }
  0xf9   : > { %1737 = vmatpush3.msra.mxu1 %v332_v2  ;;  %v1731_v13 = vpop.f32.mrf.mxu0 }
  0xfa   : > { %1738 = vmatprep.subr.mxu1 %v1957_v1 }
  0xfb   : > { %1739 = vmatpush3.msra.mxu1 %v331_v3 }
  0xfc   : > { %1741 = vmatmul.mubr.msk.f32.vlgmr.msra.gmra.mxu1 %vm337_vm1, %v603_v12  ;;  %1763 = vmatprep.subr.bf16.mxu1 %v1850_v17 }
  0xfd   : > { %1764 = vmatpush3.bf16.msra.mxu1 %v1850_v17 }
  0xfe   : > { %1765 = vmatprep.subr.bf16.mxu1 %v1852_v52 }
 0x101   : > { %1766 = vmatpush3.bf16.msra.mxu1 %v1852_v52  ;;  %v2321_v52 = vld [vmem:[%s2532_s5 + $0x88] sm:$0xff]  }
 0x102   : > { %1767 = vmatprep.subr.bf16.mxu1 %v1854_v54 }
 0x105   : > { %1768 = vmatpush3.bf16.msra.mxu1 %v1854_v54 }
 0x106   : > { %1769 = vmatprep.subr.bf16.mxu1 %v1856_v0 }
 0x109   : > { %1770 = vmatpush3.bf16.msra.mxu1 %v1856_v0 }
 0x10a   : > { %1771 = vmatprep.subr.bf16.mxu1 %v1858_v24 }
 0x10d   : > { %1772 = vmatpush3.bf16.msra.mxu1 %v1858_v24 }
 0x1b4   : > { %v530_v18 = vpop.f32.mrf.mxu1 }
 0x1b5   : > { %v680_v20 = vmul.f32 %v530_v18, %v530_v18 }
 0x1b6   : > { %v1720_v19 = vpop.f32.mrf.mxu1 }
 0x1bc   : > { %v676_v21 = vpop.f32.mrf.mxu1 }
 0x1bd   : > { %v681_v1 = vsub.f32 %v676_v21, %v680_v20 }
 0x1be   : > { %v1742_v22 = vpop.f32.mrf.mxu1 }
 0x1bf   : > { %v682_v23 = vadd.f32 1e-06, %v681_v1 }
 0x1c1   : > { %1877 = vrsqrt.f32 %v682_v23  ;;  %v1857_v23 = vld [vmem:[%s2532_s5 + $0x38] sm:$0xff]  }
 0x1ce   : > { %v1878_v28 = vpop.eup %1877 }
 0x1cf   : > { %v684_v29 = vmul.f32 %v1878_v28, %v335_v26 }
 0x1d1   : > { %v685_v31 = vmul.f32 %v684_v29, %v530_v18  ;;  %v690_v32 = vrot.slane %v684_v29, %v2186_v27 }
 0x1d3   : > { %v686_v33 = vsub.f32 %v336_v30, %v685_v31  ;;  %v693_v34 = vmul.f32 %v690_v32, %v2089_v7  ;;  %v691_v36 = vmul.f32 %v690_v32, %v2085_v5  ;;  %v694_v37 = vmul.f32 %v690_v32, %v2093_v8 }
 0x1d4   : > { %v692_v38 = vmul.f32 %v690_v32, %v2087_v6  ;;  %v695_v39 = vmul.f32 %v690_v32, %v2095_v9  ;;  %v696_v40 = vmul.f32 %v690_v32, %v2097_v10  ;;  %v698_v41 = vmul.f32 %v690_v32, %v2109_v16 }
 0x1d5   : > { %v703_v35 = vrot.slane %v686_v33, %v2186_v27  ;;  %v697_v47 = vmul.f32 %v690_v32, %v2107_v15  ;;  %v1851_v15 = vld [vmem:[%s2532_s5 + $0x50] sm:$0xff]  }
 0x1d6   : > { %1745 = vmatprep.subr.bf16.mxu0 %v1851_v15 }
 0x1d7   : > { %v707_v42 = vadd.f32 %v703_v35, %v693_v34  ;;  %v705_v43 = vadd.f32 %v703_v35, %v691_v36  ;;  %v708_v44 = vadd.f32 %v703_v35, %v694_v37  ;;  %v706_v45 = vadd.f32 %v703_v35, %v692_v38  ;;  %1746 = vmatpush3.bf16.msra.mxu0 %v1851_v15 }
 0x1d8   : > { %v709_v46 = vadd.f32 %v703_v35, %v695_v39  ;;  %v710_v7 = vadd.f32 %v703_v35, %v696_v40  ;;  %v712_v8 = vadd.f32 %v703_v35, %v698_v41  ;;  %v711_v6 = vadd.f32 %v703_v35, %v697_v47  ;;  %1747 = vmatprep.subr.bf16.mxu0 %v1853_v53 }
 0x1d9   : > { %v715_v48 = vmul.f32 0.5, %v707_v42  ;;  %v713_v5 = vmul.f32 0.5, %v705_v43  ;;  %v716_v49 = vmul.f32 0.5, %v708_v44  ;;  %v714_v50 = vmul.f32 0.5, %v706_v45  ;;  %v1859_v42 = vld [vmem:[%s2532_s5 + $0x30] sm:$0xff]  }
 0x1da   : > { %v2201_v9 = vmul.f32 0.5, %v709_v46  ;;  %v2203_v10 = vmul.f32 0.5, %v710_v7  ;;  %v2205_v16 = vmul.f32 0.5, %v712_v8  ;;  %v2207_v51 = vmul.f32 0.5, %v711_v6  ;;  %v1863_v6 = vld [vmem:[%s2532_s5] sm:$0xff]  }
 0x1db   : > { %1879 = vtanh.f32 %v715_v48  ;;  %1748 = vmatpush3.bf16.msra.mxu0 %v1853_v53  ;;  %1773 = vmatprep.subr.bf16.mxu1 %v1863_v6 }
 0x1dc   : > { %1881 = vtanh.f32 %v713_v5  ;;  %1749 = vmatprep.subr.bf16.mxu0 %v1855_v63  ;;  %1774 = vmatpush3.bf16.msra.mxu1 %v1863_v6 }
 0x1dd   : > { %1883 = vtanh.f32 %v716_v49 }
 0x1de   : > { %1885 = vtanh.f32 %v714_v50 }
 0x1df   : > { %1887 = vtanh.f32 %v2201_v9  ;;  %1750 = vmatpush3.bf16.msra.mxu0 %v1855_v63 }
 0x1e0   : > { %1889 = vtanh.f32 %v2203_v10  ;;  %1751 = vmatprep.subr.bf16.mxu0 %v1857_v23 }
 0x1e1   : > { %1891 = vtanh.f32 %v2205_v16 }
 0x1e2   : > { %1893 = vtanh.f32 %v2207_v51 }
 0x1e3   : > { %1752 = vmatpush3.bf16.msra.mxu0 %v1857_v23  ;;  %v1961_v23 = vmov 0  }
 0x1e4   : > { %1753 = vmatprep.subr.bf16.mxu0 %v1859_v42  ;;  %800 = vst.msk [vmem:[#allocation2] sm:$0xf] %vm799_vm7, %v1961_v23  ;;  %801 = vst.msk [vmem:[#allocation2 + $0x24] sm:$0xf] %vm799_vm7, %v1961_v23 }
 0x1e7   : > { %1754 = vmatpush3.bf16.msra.mxu0 %v1859_v42 }
 0x1e8   : > { %v1880_v55 = vpop.eup %1879  ;;  %1783 = vmatprep.subr.bf16.mxu0 %v2321_v52 }
 0x1e9   : > { %v1882_v56 = vpop.eup %1881  ;;  %v731_v57 = vadd.f32 1.0, %v1880_v55 }
 0x1ea   : > { %v1884_v58 = vpop.eup %1883  ;;  %v729_v59 = vadd.f32 1.0, %v1882_v56 }
 0x1eb   : > { %v1886_v60 = vpop.eup %1885  ;;  %v2225_v61 = vmul.f32 %v731_v57, %v715_v48  ;;  %v732_v62 = vadd.f32 1.0, %v1884_v58 }
 0x1ec   : > { %v1888_v2 = vpop.eup %1887  ;;  %v2233_v3 = vmul.f32 %v729_v59, %v713_v5  ;;  %v730_v4 = vadd.f32 1.0, %v1886_v60 }
 0x1ed   : > { %v1890_v11 = vpop.eup %1889  ;;  %v1634_v12 = vpack.c.bf16 %v2225_v61, %v2225_v61  ;;  %v2237_v13 = vmul.f32 %v732_v62, %v716_v49  ;;  %v776_v19 = vrot.slane %v2225_v61, 1  ;;  %v750_v1 = vrot.slane %v2225_v61, 7 }
 0x1ee   : > { %v1892_v14 = vpop.eup %1891  ;;  %v1632_v17 = vpack.c.bf16 %v2233_v3, %v2233_v3  ;;  %v2241_v18 = vmul.f32 %v730_v4, %v714_v50  ;;  %v774_v20 = vrot.slane %v2233_v3, 1  ;;  %v733_v22 = vadd.f32 1.0, %v1888_v2 }
 0x1ef   : > { %v1894_v21 = vpop.eup %1893  ;;  %871 = vrot.lane.b32.xlu1 %v1634_v12, %s1959_s21  ;;  %v1635_v26 = vpack.c.bf16 %v2237_v13, %v2237_v13  ;;  %v777_v29 = vrot.slane %v2237_v13, 1  ;;  %v736_v30 = vadd.f32 1.0, %v1892_v14  ;;  %v734_v33 = vadd.f32 1.0, %v1890_v11 }
 0x1f0   : > { %867 = vrot.lane.b32.xlu0 %v1632_v17, %s1959_s21  ;;  %v775_v28 = vrot.slane %v2241_v18, 1  ;;  %v1633_v31 = vpack.c.bf16 %v2241_v18, %v2241_v18  ;;  %v2263_v32 = vmul.f32 %v733_v22, %v2201_v9  ;;  %v735_v34 = vadd.f32 1.0, %v1894_v21 }
 0x1f1   : > { %v2272_v37 = vmul.f32 %v736_v30, %v2205_v16  ;;  %v749_v38 = vrot.slane %v2241_v18, 7  ;;  %v748_v43 = vrot.slane %v2233_v3, 7  ;;  %v787_v44 = vsel %vm782_vm3, %v776_v19, %v777_v29 }
 0x1f2   : > { %v788_v35 = vsel %vm782_vm3, %v775_v28, %v776_v19  ;;  %v789_v36 = vsel %vm782_vm3, %v774_v20, %v775_v28  ;;  %v778_v41 = vrot.slane %v2263_v32, 1  ;;  %v2293_v7 = vmul.f32 %v734_v33, %v2203_v10 }
 0x1f3   : > { %873 = vrot.lane.b32.xlu1 %v1635_v26, %s1959_s21  ;;  %v792_v39 = vsel %vm773_vm2, 0.0, %v788_v35  ;;  %v791_v40 = vsel %vm773_vm2, 0.0, %v789_v36  ;;  %v2296_v47 = vmul.f32 %v735_v34, %v2207_v51  ;;  %v762_v49 = vsel %vm756_vm4, %v749_v38, %v750_v1 }
 0x1f4   : > { %869 = vrot.lane.b32.xlu0 %v1633_v31, %s1959_s21  ;;  %v1641_v45 = vpack.c.bf16 %v792_v39, %v792_v39  ;;  %v786_v46 = vsel %vm782_vm3, %v777_v29, %v778_v41  ;;  %v1640_v48 = vpack.c.bf16 %v791_v40, %v791_v40  ;;  %v755_v8 = vrot.slane %v2272_v37, 7 }
 0x1f5   : > { %v794_v5 = vsel %vm773_vm2, 0.0, %v786_v46  ;;  %v793_v50 = vsel %vm773_vm2, 0.0, %v787_v44  ;;  %v767_v9 = vsel %vm747_vm5, 0.0, %v762_v49  ;;  %v779_v51 = vrot.slane %v2293_v7, 1 }
 0x1f6   : > { %v764_v10 = vsel %vm756_vm4, %v755_v8, %v748_v43  ;;  %v1643_v16 = vpack.c.bf16 %v794_v5, %v794_v5  ;;  %v780_v15 = vrot.slane %v2296_v47, 1  ;;  %v1642_v53 = vpack.c.bf16 %v793_v50, %v793_v50  ;;  %v957_v5 = vld [vmem:[#allocation2] sm:$0xf] }
 0x1f7   : > { %926 = vrot.lane.b32.xlu1 %v1641_v45, %s1960_s13  ;;  %v1637_v54 = vpack.c.bf16 %v2293_v7, %v2293_v7  ;;  %v1626_v55 = vpack.c.bf16 %v767_v9, %v767_v9  ;;  %v1636_v56 = vpack.c.bf16 %v2263_v32, %v2263_v32  ;;  %v781_v57 = vrot.slane %v2272_v37, 1 }
 0x1f8   : > { %924 = vrot.lane.b32.xlu0 %v1640_v48, %s1960_s13  ;;  %v765_v58 = vsel %vm747_vm5, 0.0, %v764_v10  ;;  %v751_v59 = vrot.slane %v2237_v13, 7  ;;  %v763_v62 = vsel %vm756_vm4, %v748_v43, %v749_v38  ;;  %v752_v63 = vrot.slane %v2263_v32, 7 }
 0x1f9   : > { %837 = vst.msk [vmem:[#allocation2 + $0xc] sm:$0xf] %vm834_vm6, %v1626_v55  ;;  %v1624_v60 = vpack.c.bf16 %v765_v58, %v765_v58  ;;  %v753_v0 = vrot.slane %v2293_v7, 7  ;;  %v784_v2 = vsel %vm782_vm3, %v779_v51, %v780_v15  ;;  %v766_v11 = vsel %vm747_vm5, 0.0, %v763_v62 }
 0x1fa   : > { %v761_v4 = vsel %vm756_vm4, %v750_v1, %v751_v59  ;;  %v1625_v13 = vpack.c.bf16 %v766_v11, %v766_v11  ;;  %v760_v17 = vsel %vm756_vm4, %v751_v59, %v752_v63  ;;  %v785_v21 = vsel %vm782_vm3, %v778_v41, %v779_v51  ;;  %v1866_v59 = vld [vmem:[%s2532_s5 + $0x78] sm:$0xff]   ;;  %v1871_v11 = vld [vmem:[%s2532_s5 + $0x68] sm:$0xff]  }
 0x1fb   : > { %930 = vrot.lane.b32.xlu1 %v1643_v16, %s1960_s13  ;;  %835 = vst.msk [vmem:[#allocation2 + $0x4] sm:$0xf] %vm834_vm6, %v1624_v60  ;;  %v768_v12 = vsel %vm747_vm5, 0.0, %v761_v4  ;;  %v759_v14 = vsel %vm756_vm4, %v752_v63, %v753_v0  ;;  %v769_v19 = vsel %vm747_vm5, 0.0, %v760_v17  ;;  %v754_v24 = vrot.slane %v2296_v47, 7  ;;  %v1868_v63 = vld [vmem:[%s2532_s5 + $0x70] sm:$0xff]  }
 0x1fc   : > { %928 = vrot.lane.b32.xlu0 %v1642_v53, %s1960_s13  ;;  %v1627_v61 = vpack.c.bf16 %v768_v12, %v768_v12  ;;  %v770_v18 = vsel %vm747_vm5, 0.0, %v759_v14  ;;  %836 = vst.msk [vmem:[#allocation2 + $0x8] sm:$0xf] %vm834_vm6, %v1625_v13  ;;  %v1628_v22 = vpack.c.bf16 %v769_v19, %v769_v19  ;;  %v1639_v26 = vpack.c.bf16 %v2272_v37, %v2272_v37 }
 0x1fd   : > { %v1629_v1 = vpack.c.bf16 %v770_v18, %v770_v18  ;;  %v1638_v28 = vpack.c.bf16 %v2296_v47, %v2296_v47  ;;  %v796_v29 = vsel %vm773_vm2, 0.0, %v784_v2  ;;  %v757_v30 = vsel %vm756_vm4, %v754_v24, %v755_v8 }
 0x1fe   : > { %838 = vst.msk [vmem:[#allocation2 + $0x10] sm:$0xf] %vm834_vm6, %v1627_v61  ;;  %839 = vst.msk [vmem:[#allocation2 + $0x14] sm:$0xf] %vm834_vm6, %v1628_v22  ;;  %v758_v31 = vsel %vm756_vm4, %v753_v0, %v754_v24  ;;  %v795_v32 = vsel %vm773_vm2, 0.0, %v785_v21  ;;  %v790_v33 = vsel %vm782_vm3, %v781_v57, %v774_v20  ;;  %v772_v34 = vsel %vm747_vm5, 0.0, %v757_v30 }
 0x1ff   : > { %877 = vrot.lane.b32.xlu1 %v1637_v54, %s1959_s21  ;;  %840 = vst.msk [vmem:[#allocation2 + $0x18] sm:$0xf] %vm834_vm6, %v1629_v1  ;;  %v771_v35 = vsel %vm747_vm5, 0.0, %v758_v31  ;;  %v783_v36 = vsel %vm782_vm3, %v780_v15, %v781_v57  ;;  %v1631_v37 = vpack.c.bf16 %v772_v34, %v772_v34  ;;  %v1645_v39 = vpack.c.bf16 %v796_v29, %v796_v29  ;;  %v1873_v61 = vld [vmem:[%s2532_s5 + $0x60] sm:$0xff]  }
 0x200   : > { %875 = vrot.lane.b32.xlu0 %v1636_v56, %s1959_s21  ;;  %v1630_v38 = vpack.c.bf16 %v771_v35, %v771_v35  ;;  %v1644_v40 = vpack.c.bf16 %v795_v32, %v795_v32  ;;  %v798_v3 = vsel %vm773_vm2, 0.0, %v790_v33  ;;  %v797_v20 = vsel %vm773_vm2, 0.0, %v783_v36  ;;  %v1865_v56 = vld [vmem:[%s2532_s5 + $0x80] sm:$0xff]  }
 0x201   : > { %842 = vst.msk [vmem:[#allocation2 + $0x20] sm:$0xf] %vm834_vm6, %v1631_v37  ;;  %v1647_v41 = vpack.c.bf16 %v798_v3, %v798_v3  ;;  %v1646_v42 = vpack.c.bf16 %v797_v20, %v797_v20  ;;  %v1406_v30 = vld [vmem:[%s2533_s6] sm:$0x1] }
 0x202   : > { %841 = vst.msk [vmem:[#allocation2 + $0x1c] sm:$0xf] %vm834_vm6, %v1630_v38 }
 0x203   : > { %881 = vrot.lane.b32.xlu1 %v1639_v26, %s1959_s21 }
 0x204   : > { %879 = vrot.lane.b32.xlu0 %v1638_v28, %s1959_s21  ;;  %s317_s21 = scalar_lea.vmem %s2534_s7, %s2071_s23  ;;  %s1521_s23 = sshll.u32 %s307_s25, 6 }
 0x205   : > { %v1407_v31 = vld [vmem:[%s317_s21] sm:$0x1]  ;;  %s2458_s26 = scalar_lea.vmem [#allocation3], %s1521_s23  ;;  %s1899_s21 = sshll.u32 %s1962_s20, 4  ;;  %s1900_s21 = int_to_ptr.vmem [resolvable:$false] %s1899_s21 }
 0x206   : > { %v1408_v35 = vadd.f32 %v1407_v31, %v1406_v30  ;;  %s1446_s12 = sshll.u32 %s2458_s26, 4  ;;  %s1901_s22 = scalar_lea.vmem %s1900_s21, 2048  ;;  %s2479_s12 = int_to_ptr.vmem [resolvable:$true] %s1446_s12 }
 0x207   : > { %934 = vrot.lane.b32.xlu1 %v1645_v39, %s1960_s13  ;;  %s1895_s19 = scalar_lea.vmem %s2479_s12, 1024  ;;  %p1902_p0 = scmp.lt.s32.totalorder %s2479_s12, %s1900_s21 }
 0x208   : > { %932 = vrot.lane.b32.xlu0 %v1644_v40, %s1960_s13  ;;  %v1413_v40 = vrot.slane %v1408_v35, %v2186_v27  ;;  %p1896_p11 = scmp.ne.s32.totalorder %s2479_s12, %s1895_s19  ;;  %p1903_p1 = scmp.lt.s32.totalorder %s1901_s22, %s1895_s19 }
 0x20a   : > { %p1897_p12 = pnand %p1896_p11, %p2048_p5  ;;  %p1904_p2 = por %p1903_p1, %p1902_p0 }
 0x20b   : > { %938 = vrot.lane.b32.xlu1 %v1647_v41, %s1960_s13 }
 0x20c   : > { %936 = vrot.lane.b32.xlu0 %v1646_v42, %s1960_s13  ;;  %p1898_p13 = pneg %p1897_p12 }
 0x20e   : > { %p1905_p3 = pnand %p1904_p2, %p1898_p13 }
 0x261   : > { %v872_v43 = vpop.permute.xlu1 %871 }
 0x262   : > { %894 = vst.msk [vmem:[#allocation2 + $0xc] sm:$0xf] %vm891_vm8, %v872_v43  ;;  %v868_v44 = vpop.permute.xlu0 %867 }
 0x263   : > { %892 = vst.msk [vmem:[#allocation2 + $0x4] sm:$0xf] %vm891_vm8, %v868_v44 }
 0x265   : > { %v874_v45 = vpop.permute.xlu1 %873 }
 0x266   : > { %895 = vst.msk [vmem:[#allocation2 + $0x10] sm:$0xf] %vm891_vm8, %v874_v45  ;;  %v870_v25 = vpop.permute.xlu0 %869 }
 0x267   : > { %893 = vst.msk [vmem:[#allocation2 + $0x8] sm:$0xf] %vm891_vm8, %v870_v25 }
 0x269   : > { %v927_v46 = vpop.permute.xlu1 %926 }
 0x26a   : > { %950 = vst.msk [vmem:[#allocation2 + $0x8] sm:$0xf] %vm948_vm9, %v927_v46  ;;  %v925_v7 = vpop.permute.xlu0 %924 }
 0x26b   : > { %949 = vst.msk [vmem:[#allocation2 + $0x4] sm:$0xf] %vm948_vm9, %v925_v7 }
 0x26d   : > { %v931_v47 = vpop.permute.xlu1 %930 }
 0x26e   : > { %952 = vst.msk [vmem:[#allocation2 + $0x10] sm:$0xf] %vm948_vm9, %v931_v47  ;;  %v929_v48 = vpop.permute.xlu0 %928 }
 0x26f   : > { %951 = vst.msk [vmem:[#allocation2 + $0xc] sm:$0xf] %vm948_vm9, %v929_v48 }
 0x271   : > { %v878_v49 = vpop.permute.xlu1 %877  ;;  %v959_v8 = vld [vmem:[#allocation2 + $0x8] sm:$0xf] }
 0x272   : > { %897 = vst.msk [vmem:[#allocation2 + $0x18] sm:$0xf] %vm891_vm8, %v878_v49  ;;  %v876_v50 = vpop.permute.xlu0 %875  ;;  %v958_v6 = vld [vmem:[#allocation2 + $0x4] sm:$0xf] }
 0x273   : > { %896 = vst.msk [vmem:[#allocation2 + $0x14] sm:$0xf] %vm891_vm8, %v876_v50  ;;  %v1564_v9 = vcombine.low %v958_v6, %v959_v8  ;;  %v1578_v10 = vcombine.low %v957_v5, %v958_v6 }
 0x275   : > { %v961_v16 = vld [vmem:[#allocation2 + $0x10] sm:$0xf]  ;;  %1755 = vmatprep.mubr.msk.bf16.mxu0 %vm1047_vm10, %v1564_v9  ;;  %1775 = vmatprep.mubr.msk.bf16.mxu1 %vm1047_vm10, %v1578_v10  ;;  %v882_v51 = vpop.permute.xlu1 %881 }
 0x276   : > { %v960_v15 = vld [vmem:[#allocation2 + $0xc] sm:$0xf]  ;;  %899 = vst.msk [vmem:[#allocation2 + $0x20] sm:$0xf] %vm891_vm8, %v882_v51  ;;  %v880_v53 = vpop.permute.xlu0 %879 }
 0x277   : > { %v1565_v54 = vcombine.low %v960_v15, %v961_v16  ;;  %v1579_v55 = vcombine.low %v959_v8, %v960_v15  ;;  %898 = vst.msk [vmem:[#allocation2 + $0x1c] sm:$0xf] %vm891_vm8, %v880_v53  ;;  %v1872_v18 = vld [vmem:[#allocation2 + $0x8] sm:$0xff]  }
 0x279   : > { %1756 = vmatmul.mubr.msk.bf16.vlgmr.msra.gmra.mxu0 %vm1047_vm10, %v1565_v54  ;;  %1776 = vmatmul.mubr.msk.bf16.vlgmr.msra.gmra.mxu1 %vm1047_vm10, %v1579_v55  ;;  %v935_v57 = vpop.permute.xlu1 %934 }
 0x27a   : > { %954 = vst.msk [vmem:[#allocation2 + $0x18] sm:$0xf] %vm948_vm9, %v935_v57  ;;  %v933_v58 = vpop.permute.xlu0 %932  ;;  %1784 = vmatpush3.bf16.msra.mxu0 %v2321_v52 }
 0x27b   : > { %953 = vst.msk [vmem:[#allocation2 + $0x14] sm:$0xf] %vm948_vm9, %v933_v58  ;;  %1785 = vmatprep.subr.bf16.mxu0 %v1865_v56 }
 0x27d   : > { %v939_v60 = vpop.permute.xlu1 %938 }
 0x27e   : > { %956 = vst.msk [vmem:[#allocation2 + $0x20] sm:$0xf] %vm948_vm9, %v939_v60  ;;  %v937_v62 = vpop.permute.xlu0 %936  ;;  %1786 = vmatpush3.bf16.msra.mxu0 %v1865_v56 }
 0x27f   : > { %955 = vst.msk [vmem:[#allocation2 + $0x1c] sm:$0xf] %vm948_vm9, %v937_v62  ;;  %1787 = vmatprep.subr.bf16.mxu0 %v1866_v59 }
 0x281   : > { %v963_v52 = vld [vmem:[#allocation2 + $0x18] sm:$0xf] }
 0x282   : > { %1788 = vmatpush3.bf16.msra.mxu0 %v1866_v59  ;;  %v962_v0 = vld [vmem:[#allocation2 + $0x14] sm:$0xf] }
 0x283   : > { %v1566_v2 = vcombine.low %v962_v0, %v963_v52  ;;  %v1580_v4 = vcombine.low %v961_v16, %v962_v0  ;;  %1789 = vmatprep.subr.bf16.mxu0 %v1868_v63  ;;  %v1874_v19 = vld [vmem:[#allocation2 + $0x10] sm:$0xff]  }
 0x285   : > { %1759 = vmatprep.mubr.msk.bf16.mxu0 %vm1047_vm10, %v1566_v2  ;;  %1779 = vmatprep.mubr.msk.bf16.mxu1 %vm1047_vm10, %v1580_v4  ;;  %v977_v12 = vld [vmem:[#allocation2 + $0x20] sm:$0xf] }
 0x286   : > { %1790 = vmatpush3.bf16.msra.mxu0 %v1868_v63  ;;  %v964_v13 = vld [vmem:[#allocation2 + $0x1c] sm:$0xf]  ;;  %v1876_v1 = vld [vmem:[#allocation2 + $0x20] sm:$0xff]  }
 0x287   : > { %v1567_v14 = vcombine.low %v964_v13, %v977_v12  ;;  %v1581_v17 = vcombine.low %v963_v52, %v964_v13  ;;  %1791 = vmatprep.subr.bf16.mxu0 %v1871_v11  ;;  %v1875_v21 = vld [vmem:[#allocation2 + $0x18] sm:$0xff]  }
 0x289   : > { %1760 = vmatmul.mubr.msk.bf16.gmra.mxu0 %vm1047_vm10, %v1567_v14  ;;  %1780 = vmatmul.mubr.msk.bf16.gmra.mxu1 %vm1047_vm10, %v1581_v17 }
 0x28a   : > { %1792 = vmatpush3.bf16.msra.mxu0 %v1871_v11  ;;  %1795 = vmatprep.mubr.msk.bf16.mxu0 %vm1047_vm10, %v1872_v18 }
 0x28b   : > { %1793 = vmatprep.subr.bf16.mxu0 %v1873_v61 }
 0x28e   : > { %1794 = vmatpush3.bf16.msra.mxu0 %v1873_v61 }
 0x291   : > { %1796 = vmatmul.mubr.msk.bf16.vlgmr.msra.gmra.mxu0 %vm1047_vm10, %v1874_v19 }
 0x292   : > { %1799 = vmatprep.mubr.msk.bf16.mxu0 %vm1047_vm10, %v1875_v21 }
 0x299   : > { %1800 = vmatmul.mubr.msk.bf16.gmra.mxu0 %vm1047_vm10, %v1876_v1 }
 0x339   : > { %v1757_v22 = vpop.f32.mrf.mxu0  ;;  %v1777_v24 = vpop.f32.mrf.mxu1 }
 0x33a   : > { %v1222_v3 = vadd.f32 %v1777_v24, %v1757_v22 }
 0x33b   : > { %v1094_v23 = vpop.f32.mrf.mxu0  ;;  %v1213_v28 = vpop.f32.mrf.mxu1 }
 0x33c   : > { %v1214_v41 = vadd.f32 %v1213_v28, %v1094_v23 }
 0x33d   : > { %v1758_v26 = vpop.f32.mrf.mxu0  ;;  %v1778_v32 = vpop.f32.mrf.mxu1 }
 0x33e   : > { %v1225_v45 = vadd.f32 %v1778_v32, %v1758_v26 }
 0x33f   : > { %v1097_v29 = vpop.f32.mrf.mxu0  ;;  %v1216_v36 = vpop.f32.mrf.mxu1 }
 0x340   : > { %v1217_v47 = vadd.f32 %v1216_v36, %v1097_v29 }
 0x349   : > { %v1761_v33 = vpop.f32.mrf.mxu0  ;;  %v1781_v38 = vpop.f32.mrf.mxu1 }
 0x34a   : > { %v1238_v8 = vadd.f32 %v1781_v38, %v1761_v33 }
 0x34b   : > { %v1110_v34 = vpop.f32.mrf.mxu0  ;;  %v1229_v43 = vpop.f32.mrf.mxu1 }
 0x34c   : > { %v1230_v10 = vadd.f32 %v1229_v43, %v1110_v34 }
 0x34d   : > { %v1762_v37 = vpop.f32.mrf.mxu0  ;;  %v1782_v5 = vpop.f32.mrf.mxu1 }
 0x34e   : > { %v1241_v54 = vadd.f32 %v1782_v5, %v1762_v37 }
 0x34f   : > { %v1113_v39 = vpop.f32.mrf.mxu0  ;;  %v1232_v15 = vpop.f32.mrf.mxu1 }
 0x350   : > { %v1233_v58 = vadd.f32 %v1232_v15, %v1113_v39 }
 0x351   : > { %v1797_v20 = vpop.f32.mrf.mxu0 }
 0x352   : > { %v1400_v42 = vadd.f32 %v1797_v20, %v1222_v3 }
 0x353   : > { %v1367_v44 = vpop.f32.mrf.mxu0 }
 0x354   : > { %v1417_v25 = vadd.f32 %v1413_v40, %v1400_v42  ;;  %v1398_v46 = vadd.f32 %v1367_v44, %v1214_v41 }
 0x355   : > { %v1798_v7 = vpop.f32.mrf.mxu0 }
 0x356   : > { %1426 = vst.msk [vmem:[%s2458_s26 + $0x10] sm:$0xff] %vm1423_vm11, %v1417_v25  ;;  %v1415_v27 = vadd.f32 %v1413_v40, %v1398_v46  ;;  %v1401_v48 = vadd.f32 %v1798_v7, %v1225_v45 }
 0x357   : > { %v1370_v49 = vpop.f32.mrf.mxu0 }
 0x358   : > { %1424 = vst.msk [vmem:[%s2458_s26] sm:$0xff] %vm1423_vm11, %v1415_v27  ;;  %v1418_v50 = vadd.f32 %v1413_v40, %v1401_v48  ;;  %v1399_v6 = vadd.f32 %v1370_v49, %v1217_v47 }
 0x359   : > { %v1801_v9 = vpop.f32.mrf.mxu0 }
 0x35a   : > { %1427 = vst.msk [vmem:[%s2458_s26 + $0x18] sm:$0xff] %vm1423_vm11, %v1418_v50  ;;  %v1416_v16 = vadd.f32 %v1413_v40, %v1399_v6  ;;  %v1404_v51 = vadd.f32 %v1801_v9, %v1238_v8 }
 0x35b   : > { %v1383_v53 = vpop.f32.mrf.mxu0 }
 0x35c   : > { %1425 = vst.msk [vmem:[%s2458_s26 + $0x8] sm:$0xff] %vm1423_vm11, %v1416_v16  ;;  %v1421_v55 = vadd.f32 %v1413_v40, %v1404_v51  ;;  %v1402_v56 = vadd.f32 %v1383_v53, %v1230_v10 }
 0x35d   : > { %v1802_v57 = vpop.f32.mrf.mxu0 }
 0x35e   : > { %1430 = vst.msk [vmem:[%s2458_s26 + $0x30] sm:$0xff] %vm1423_vm11, %v1421_v55  ;;  %v1419_v59 = vadd.f32 %v1413_v40, %v1402_v56  ;;  %v1405_v60 = vadd.f32 %v1802_v57, %v1241_v54 }
 0x35f   : > { %v1386_v62 = vpop.f32.mrf.mxu0 }
 0x360   : > { %1428 = vst.msk [vmem:[%s2458_s26 + $0x20] sm:$0xff] %vm1423_vm11, %v1419_v59  ;;  %v1422_v63 = vadd.f32 %v1413_v40, %v1405_v60  ;;  %v1403_v52 = vadd.f32 %v1386_v62, %v1233_v58 }
 0x362   : > { %1431 = vst.msk [vmem:[%s2458_s26 + $0x38] sm:$0xff] %vm1423_vm11, %v1422_v63  ;;  %v1420_v0 = vadd.f32 %v1413_v40, %v1403_v52 }
 0x364   : > { %1429 = vst.msk [vmem:[%s2458_s26 + $0x28] sm:$0xff] %vm1423_vm11, %v1420_v0 }
 0x365   : > { %1908 = shalt.err (!%p1905_p3)
}
 0x366   : > { %s1909_s24 = scalar_lea.hbm %s2477_s18, 1024  ;;  %s1913_s26 = scalar_lea.hbm %s2535_s8, 2048 }
 0x367   : > { %p1910_p4 = scmp.ne.s32.totalorder %s2477_s18, %s1909_s24  ;;  %p1914_p9 = scmp.lt.s32.totalorder %s2477_s18, %s2535_s8 }
 0x368   : > { %p1915_p10 = scmp.lt.s32.totalorder %s1913_s26, %s1909_s24 }
 0x369   : > { %p1911_p7 = pnand %p1910_p4, %p2048_p5 }
 0x36a   : > { %p1916_p11 = por %p1915_p10, %p1914_p9 }
 0x36b   : > { %p1912_p8 = pneg %p1911_p7 }
 0x36d   : > { %p1917_p12 = pnand %p1916_p11, %p1912_p8 }
 0x36f   : > { %1920 = shalt.err (!%p1917_p12)
}
 0x370   : > { %s1963_s17 = smov 128   ;;  %s1964_s19 = smov 8  }
 0x371   : > { %1803 = dma.vmem_to_hbm [thread:$0]  (%p2048_p5), %s2479_s12, 1024, %s2477_s18, %s2487_s9, %s1963_s17, %s1963_s17, %s1964_s19  }
 0x372 PF: > { %p1809_p13 = scmp.ge.s32.totalorder %s1955_s30, 2  ;;  %s1461_s20 = sand.u32 1, %s1943_s27  }
 0x373   : > { %s1462_s21 = scalar_lea.sflag [#allocation4], %s1461_s20 }
 0x374   : > { %p1806_p0 = pnand %p1809_p13, %p2052_p6 }
 0x376   : > { %p1807_p1 = pneg %p1806_p0 }
 0x378   : > { %1938 = dma.done.wait (%p1807_p1), %s1462_s21, 1024  }
 0x379   : > { %1940 = vsyncadd (%p1807_p1), %s1462_s21, 4294966272  ;;  %p18_p2 = scmp.ge.s32.totalorder %s2035_s11, 4   ;;  %s2538_s27 = smov %s1947_s28 }
 0x37a   : > { %s2539_s28 = smov %s1951_s29  ;;  %s2540_s29 = smov %s2046_s14 }
 0x37b   : > { %s2541_s30 = smov %s2035_s11  ;;  %20 = sbr.rel (!%p18_p2) target bundleno = 3 (0x3), region = 92 }
 0x380   :  { %1467 = vsyncpa [#allocation4], 1 }
 0x381   :  { %1469 = vsyncpa [#allocation4 + $0x1], 1 }

</bundles_post_ra>
